<compile_context>
chip_gen: v7x
topology: tpu7x:2x2x1
jax: 0.10.0
libtpu: 0.0.40
codegen_flags: <defaults>
</compile_context>

<pallas_src>
import functools

import jax
import jax.numpy as jnp
from jax import lax
from jax.experimental import pallas as pl
from jax.experimental.pallas import tpu as pltpu

_EPS = 1e-07
_LANES = 128
_TARGET_TILE_BYTES = 4 * 1024 * 1024   # per-input HBM->VMEM DMA tile
_CHUNK_ROWS = 1024                     # rows per in-kernel compute chunk
_VMEM_LIMIT_BYTES = 32 * 1024 * 1024   # safe on v5e / v6e / v7x


def _round_up(x, m):
    return (x + m - 1) // m * m


def _num_tensorcores():
    """2 on dual-TensorCore chips (v7x / v4 megacore), else 1."""
    try:
        kind = jax.devices()[0].device_kind.lower()
    except Exception:
        return 1
    return 2 if ("v7" in kind or "v4" in kind) else 1


def _bce_sum_kernel(recon_ref, x_ref, out_ref, acc_ref, *,
                    two_d_grid, tiles_per_core, tile_rows, chunk_rows,
                    valid_rows, needs_mask):
    if two_d_grid:
        c = pl.program_id(0)          # TensorCore split (parallel)
        i = pl.program_id(1)          # row tile within this core (reduction)
    else:
        c = 0
        i = pl.program_id(0)

    # ---- init per-core accumulator ----
    @pl.when(i == 0)
    def _():
        acc_ref[...] = jnp.zeros_like(acc_ref)

    row0 = (c * tiles_per_core + i) * tile_rows
    num_chunks = tile_rows // chunk_rows

    def _chunk(j, carry):
        start = pl.multiple_of(j * chunk_rows, chunk_rows)
        r = jnp.clip(recon_ref[pl.ds(start, chunk_rows), :].astype(jnp.float32),
                     _EPS, 1.0 - _EPS)
        t = jnp.clip(x_ref[pl.ds(start, chunk_rows), :].astype(jnp.float32),
                     _EPS, 1.0 - _EPS)
        log_r = jnp.log(r)
        log_1mr = jnp.log(1.0 - r)
        # s == -(per-element BCE); the negate is folded into the accumulate.
        s = log_1mr + t * (log_r - log_1mr)

        if needs_mask:
            # Only chunks that overlap the padded rows pay for the mask.
            boundary = (row0 + start + chunk_rows) > valid_rows

            @pl.when(jnp.logical_not(boundary))
            def _():
                acc_ref[...] -= s.reshape(chunk_rows // 8, 8, _LANES).sum(axis=0)

            @pl.when(boundary)
            def _():
                rid = (row0 + start
                       + lax.broadcasted_iota(jnp.int32, s.shape, 0))
                sm = jnp.where(rid < valid_rows, s, 0.0)
                acc_ref[...] -= sm.reshape(chunk_rows // 8, 8, _LANES).sum(axis=0)
        else:
            acc_ref[...] -= s.reshape(chunk_rows // 8, 8, _LANES).sum(axis=0)
        return carry

    lax.fori_loop(0, num_chunks, _chunk, 0, unroll=True)

    # ---- finalize: each core emits its (8, 128) partial once ----
    @pl.when(i == tiles_per_core - 1)
    def _():
        out_ref[...] = acc_ref[...]


def vae_loss(recon_x, x, mu, logvar):
    """Pallas equivalent of LossFunction.forward.

    recon_x, x : (B, C, H, W) float32/bfloat16 in [0, 1]-ish range
    mu, logvar : (B, Z)
    returns    : scalar float32
    """
    assert recon_x.shape == x.shape
    n = recon_x.size
    assert n % _LANES == 0, "flattened image size must be a multiple of 128"
    rows = n // _LANES

    # sublane multiple per dtype (f32: 8, bf16: 16, 8-bit: 32); take the max
    # over BOTH image inputs so mixed-precision pairs stay legal.
    def _sublane(dt):
        return {4: 8, 2: 16, 1: 32}.get(jnp.dtype(dt).itemsize, 8)
    sub = max(_sublane(recon_x.dtype), _sublane(x.dtype))
    max_itemsize = max(jnp.dtype(recon_x.dtype).itemsize,
                       jnp.dtype(x.dtype).itemsize)

    num_cores = _num_tensorcores()

    # Tile rows from a byte budget so the DMA size is dtype-independent.
    max_tile_rows = max(_TARGET_TILE_BYTES // (_LANES * max_itemsize),
                        _CHUNK_ROWS)
    rows_per_core = pl.cdiv(rows, num_cores)
    if rows_per_core > _CHUNK_ROWS:
        tile_rows = min(max_tile_rows, _round_up(rows_per_core, _CHUNK_ROWS))
    else:
        tile_rows = _round_up(rows_per_core, sub)
    chunk_rows = min(_CHUNK_ROWS, tile_rows)
    assert tile_rows % chunk_rows == 0 and chunk_rows % 8 == 0

    padded_rows = _round_up(rows, tile_rows * num_cores)
    tiles_per_core = padded_rows // (tile_rows * num_cores)
    needs_mask = padded_rows != rows

    recon2d = recon_x.reshape(rows, _LANES)
    x2d = x.reshape(rows, _LANES)
    if needs_mask:
        pad = padded_rows - rows
        recon2d = jnp.pad(recon2d, ((0, pad), (0, 0)))
        x2d = jnp.pad(x2d, ((0, pad), (0, 0)))

    two_d_grid = num_cores > 1
    kernel = functools.partial(
        _bce_sum_kernel,
        two_d_grid=two_d_grid,
        tiles_per_core=tiles_per_core,
        tile_rows=tile_rows,
        chunk_rows=chunk_rows,
        valid_rows=rows,
        needs_mask=needs_mask,
    )

    if two_d_grid:
        grid = (num_cores, tiles_per_core)
        img_map = lambda c, i: (c * tiles_per_core + i, 0)
        out_map = lambda c, i: (c, 0)
        dims = ("parallel", "arbitrary")
    else:
        grid = (tiles_per_core,)
        img_map = lambda i: (i, 0)
        out_map = lambda i: (0, 0)
        dims = ("arbitrary",)

    bytes_in = n * (jnp.dtype(recon_x.dtype).itemsize
                    + jnp.dtype(x.dtype).itemsize)
    cost = pl.CostEstimate(
        flops=8 * n,
        transcendentals=2 * n,
        bytes_accessed=bytes_in + num_cores * 8 * _LANES * 4,
    )

    partials = pl.pallas_call(
        kernel,
        out_shape=jax.ShapeDtypeStruct((num_cores * 8, _LANES), jnp.float32),
        grid_spec=pltpu.PrefetchScalarGridSpec(
            num_scalar_prefetch=0,
            grid=grid,
            in_specs=[
                pl.BlockSpec((tile_rows, _LANES), img_map),   # recon_x
                pl.BlockSpec((tile_rows, _LANES), img_map),   # x
            ],
            out_specs=pl.BlockSpec((8, _LANES), out_map),
            scratch_shapes=[pltpu.VMEM((8, _LANES), jnp.float32)],
        ),
        compiler_params=pltpu.CompilerParams(
            dimension_semantics=dims,
            vmem_limit_bytes=_VMEM_LIMIT_BYTES),
        cost_estimate=cost,
    )(recon2d, x2d)

    # tiny cross-partial reduction done in XLA
    bce = jnp.sum(partials)

    # KLD: tiny (B, Z) elementwise + reduce — kept in XLA so the kernel's
    # hot loop streams only the two image tensors.
    mu_f = mu.astype(jnp.float32)
    lv_f = logvar.astype(jnp.float32)
    kld = -0.5 * jnp.sum(1.0 + lv_f - jnp.square(mu_f) - jnp.exp(lv_f))

    return bce + kld


def vae_loss_ref(recon_x, x, mu, logvar):
    eps = 1e-07
    r = jnp.clip(recon_x.astype(jnp.float32), eps, 1.0 - eps)
    t = jnp.clip(x.astype(jnp.float32), eps, 1.0 - eps)
    bce = -jnp.sum(t * jnp.log(r) + (1.0 - t) * jnp.log(1.0 - r))
    kld = -0.5 * jnp.sum(1.0 + logvar - jnp.square(mu) - jnp.exp(logvar))
    return bce + kld


if __name__ == "__main__":
    key = jax.random.PRNGKey(0)
    k1, k2, k3, k4 = jax.random.split(key, 4)

    B, C, H, W = 2, 4, 16, 16
    Z = 32

    # recon_x / x in (0, 1) like decoder outputs / normalized images
    recon_x = jax.nn.sigmoid(jax.random.normal(k1, (B, C, H, W), jnp.float32))
    x = jax.nn.sigmoid(jax.random.normal(k2, (B, C, H, W), jnp.float32))
    mu = jax.random.normal(k3, (B, Z), jnp.float32)
    logvar = 0.1 * jax.random.normal(k4, (B, Z), jnp.float32)

    loss = vae_loss(recon_x, x, mu, logvar)
    loss = jax.block_until_ready(loss)

    ref = vae_loss_ref(recon_x, x, mu, logvar)
    assert jnp.allclose(loss, ref, rtol=1e-5, atol=1e-3), (loss, ref)

    print("KERNEL_OK")
</pallas_src>

<mosaic_0001>
module attributes {stable_mosaic.version = 11 : i64} {
  func.func @_bce_sum_kernel(%arg0: i32, %arg1: memref<16x128xf32, #tpu.memory_space<vmem>>, %arg2: memref<16x128xf32, #tpu.memory_space<vmem>>, %arg3: memref<8x128xf32, #tpu.memory_space<vmem>>, %arg4: memref<8x128xf32, #tpu.memory_space<vmem>>) attributes {dimension_semantics = [#tpu.dimension_semantics<arbitrary>], iteration_bounds = array<i64: 1>, scalar_prefetch = 0 : i64, scratch_operands = 1 : i64, tpu.core_type = #tpu.core_type<tc>, window_params = [{transform_indices = @transform_0, window_bounds = array<i64: 16, 128>}, {transform_indices = @transform_1, window_bounds = array<i64: 16, 128>}, {pipeline_mode = #tpu.pipeline_mode<synchronous>, transform_indices = @transform_2, window_bounds = array<i64: 8, 128>}]} {
    %c0_i32 = arith.constant 0 : i32
    %0 = arith.cmpi eq, %arg0, %c0_i32 : i32
    %1 = arith.extui %0 : i1 to i32
    %c0_i32_0 = arith.constant 0 : i32
    %2 = arith.cmpi ne, %1, %c0_i32_0 : i32
    scf.if %2 {
      %cst_14 = arith.constant 0.000000e+00 : f32
      %32 = vector.broadcast %cst_14 : f32 to vector<8x128xf32>
      %c0_15 = arith.constant 0 : index
      %c0_16 = arith.constant 0 : index
      %33 = vector.load %arg4[%c0_15, %c0_16] : memref<8x128xf32, #tpu.memory_space<vmem>>, vector<8x128xf32>
      tpu.vector_store %arg4[%c0_15, %c0_16], %32 {strides = array<i32>} : memref<8x128xf32, #tpu.memory_space<vmem>>, vector<8x128xf32>,
    } else {
    }
    %c0_i32_1 = arith.constant 0 : i32
    %c16_i32 = arith.constant 16 : i32
    %3 = arith.muli %c0_i32_1, %c16_i32 : i32
    %4 = tpu.assume_multiple %3, 16 : i32
    %5 = arith.index_cast %4 : i32 to index
    %c0 = arith.constant 0 : index
    %6 = vector.load %arg1[%5, %c0] : memref<16x128xf32, #tpu.memory_space<vmem>>, vector<16x128xf32>
    %cst = arith.constant 1.000000e-07 : f32
    %cst_2 = arith.constant 0.99999988 : f32
    %7 = vector.broadcast %cst : f32 to vector<16x128xf32>
    %8 = arith.maximumf %7, %6 : vector<16x128xf32>
    %9 = vector.broadcast %cst_2 : f32 to vector<16x128xf32>
    %10 = arith.minimumf %9, %8 : vector<16x128xf32>
    %11 = arith.index_cast %4 : i32 to index
    %c0_3 = arith.constant 0 : index
    %12 = vector.load %arg2[%11, %c0_3] : memref<16x128xf32, #tpu.memory_space<vmem>>, vector<16x128xf32>
    %cst_4 = arith.constant 1.000000e-07 : f32
    %cst_5 = arith.constant 0.99999988 : f32
    %13 = vector.broadcast %cst_4 : f32 to vector<16x128xf32>
    %14 = arith.maximumf %13, %12 : vector<16x128xf32>
    %15 = vector.broadcast %cst_5 : f32 to vector<16x128xf32>
    %16 = arith.minimumf %15, %14 : vector<16x128xf32>
    %17 = math.log %10 : vector<16x128xf32>
    %cst_6 = arith.constant 1.000000e+00 : f32
    %18 = vector.broadcast %cst_6 : f32 to vector<16x128xf32>
    %19 = arith.subf %18, %10 : vector<16x128xf32>
    %20 = math.log %19 : vector<16x128xf32>
    %21 = arith.subf %17, %20 : vector<16x128xf32>
    %22 = arith.mulf %16, %21 : vector<16x128xf32>
    %23 = arith.addf %20, %22 : vector<16x128xf32>
    %c0_7 = arith.constant 0 : index
    %c0_8 = arith.constant 0 : index
    %24 = vector.load %arg4[%c0_7, %c0_8] : memref<8x128xf32, #tpu.memory_space<vmem>>, vector<8x128xf32>
    %25 = vector.shape_cast %23 : vector<16x128xf32> to vector<2x8x128xf32>
    %cst_9 = arith.constant dense<0.000000e+00> : vector<8x128xf32>
    %26 = vector.multi_reduction <add>, %25, %cst_9 [0] : vector<2x8x128xf32> to vector<8x128xf32>
    %27 = arith.subf %24, %26 : vector<8x128xf32>
    %c0_10 = arith.constant 0 : index
    %c0_11 = arith.constant 0 : index
    %28 = vector.load %arg4[%c0_10, %c0_11] : memref<8x128xf32, #tpu.memory_space<vmem>>, vector<8x128xf32>
    tpu.vector_store %arg4[%c0_10, %c0_11], %27 {strides = array<i32>} : memref<8x128xf32, #tpu.memory_space<vmem>>, vector<8x128xf32>,
    %c1_i32 = arith.constant 1 : i32
    %c0_i32_12 = arith.constant 0 : i32
    %29 = arith.cmpi eq, %arg0, %c0_i32_12 : i32
    %30 = arith.extui %29 : i1 to i32
    %c0_i32_13 = arith.constant 0 : i32
    %31 = arith.cmpi ne, %30, %c0_i32_13 : i32
    scf.if %31 {
      %c0_14 = arith.constant 0 : index
      %c0_15 = arith.constant 0 : index
      %32 = vector.load %arg4[%c0_14, %c0_15] : memref<8x128xf32, #tpu.memory_space<vmem>>, vector<8x128xf32>
      %c0_16 = arith.constant 0 : index
      %c0_17 = arith.constant 0 : index
      %33 = vector.load %arg3[%c0_16, %c0_17] : memref<8x128xf32, #tpu.memory_space<vmem>>, vector<8x128xf32>
      tpu.vector_store %arg3[%c0_16, %c0_17], %32 {strides = array<i32>} : memref<8x128xf32, #tpu.memory_space<vmem>>, vector<8x128xf32>,
    } else {
    }
    return
  }
  func.func @transform_0(%arg0: i32) -> (i32, i32) {
    %c0_i32 = arith.constant 0 : i32
    %c0_i32_0 = arith.constant 0 : i32
    return %arg0, %c0_i32 : i32, i32
  }
  func.func @transform_1(%arg0: i32) -> (i32, i32) {
    %c0_i32 = arith.constant 0 : i32
    %c0_i32_0 = arith.constant 0 : i32
    return %arg0, %c0_i32 : i32, i32
  }
  func.func @transform_2(%arg0: i32) -> (i32, i32) {
    %c0_i32 = arith.constant 0 : i32
    %c0_i32_0 = arith.constant 0 : i32
    %c0_i32_1 = arith.constant 0 : i32
    return %c0_i32, %c0_i32_0 : i32, i32
  }
}

</mosaic_0001>

<bundles_post_ra>
// kernel: tpu_custom_call.1
= control target key start
LH: loop header
LB: loop body
LE: loop exit
PB: predicated region body
PF: predicated region fallthrough
CT: control target
= control target key end

     0   :  { %7 = vsyncpa [#allocation4], 0  ;;  %s239_s0 = inlined_call_operand.hbm [shape: f32[16,128], index: 0, kind: input, shape index: {}]   ;;  %s240_s1 = inlined_call_operand.hbm [shape: f32[16,128], index: 1, kind: input, shape index: {}]   ;;  %s241_s2 = inlined_call_operand.hbm [shape: f32[8,128], index: 2, kind: output, shape index: {}]  }
   0x1   :  { %8 = vsyncpa [#allocation7], 0 }
   0x2   :  { %9 = vsyncpa [#allocation5], 0  ;;  %s183_s9 = smov [#allocation3]   ;;  %s111_s13 = scalar_lea.hbm %s239_s0, 256 }
   0x3   :  { %s15_s10 = sshll.u32 %s183_s9, 4  ;;  %p112_p0 = scmp.ne.s32.totalorder %s239_s0, %s111_s13  ;;  %s16_s10 = int_to_ptr.vmem [resolvable:$true] %s15_s10 }
   0x4   :  { %p115_p1 = scmp.lt.u32.totalorder %s111_s13, %s239_s0 }
   0x6   :  { %p117_p2 = pnand %p115_p1, %p112_p0 }
   0x8   :  { %120 = shalt.err (!%p117_p2)
}
   0x9   :  { %s121_s18 = scalar_lea.vmem %s16_s10, 256  ;;  %p126_p4 = scmp.lt.s32.totalorder %s16_s10, %s16_s10 }
   0xa   :  { %p122_p3 = scmp.ne.s32.totalorder %s16_s10, %s121_s18  ;;  %p127_p5 = scmp.lt.s32.totalorder %s121_s18, %s121_s18 }
   0xc   :  { %p128_p6 = por %p127_p5, %p126_p4 }
   0xe   :  { %p129_p7 = pnand %p128_p6, %p122_p3 }
  0x10   :  { %132 = shalt.err (!%p129_p7)
}
  0x11   :  { %s184_s19 = smov 128   ;;  %s185_s20 = smov 8  }
  0x12   :  { %21 = dma.hbm_to_vmem [thread:$0]  %s239_s0, 256, %s16_s10, [#allocation4], %s184_s19, %s184_s19, %s185_s20  }
  0x13   :  { %s186_s23 = smov [#allocation6]   ;;  %s133_s27 = scalar_lea.hbm %s240_s1, 256 }
  0x14   :  { %s27_s24 = sshll.u32 %s186_s23, 4  ;;  %p134_p8 = scmp.ne.s32.totalorder %s240_s1, %s133_s27  ;;  %s28_s24 = int_to_ptr.vmem [resolvable:$true] %s27_s24 }
  0x15   :  { %p137_p9 = scmp.lt.u32.totalorder %s133_s27, %s240_s1 }
  0x17   :  { %p139_p10 = pnand %p137_p9, %p134_p8 }
  0x19   :  { %142 = shalt.err (!%p139_p10)
}
  0x1a   :  { %s143_s4 = scalar_lea.vmem %s28_s24, 256  ;;  %p148_p12 = scmp.lt.s32.totalorder %s28_s24, %s28_s24 }
  0x1b   :  { %p144_p11 = scmp.ne.s32.totalorder %s28_s24, %s143_s4  ;;  %p149_p13 = scmp.lt.s32.totalorder %s143_s4, %s143_s4 }
  0x1d   :  { %p150_p0 = por %p149_p13, %p148_p12 }
  0x1f   :  { %p151_p1 = pnand %p150_p0, %p144_p11 }
  0x21   :  { %154 = shalt.err (!%p151_p1)
}
  0x22   :  { %33 = dma.hbm_to_vmem [thread:$0]  %s240_s1, 256, %s28_s24, [#allocation7], %s184_s19, %s184_s19, %s185_s20  }
  0x23   :  { %177 = dma.done.wait [#allocation4], 256  }
  0x24   :  { %178 = vsyncadd [#allocation4], 4294967040 }
  0x25   :  { %179 = dma.done.wait [#allocation7], 256  }
  0x26   :  { %180 = vsyncadd [#allocation7], 4294967040  ;;  %v45_v0 = vld [vmem:[#allocation3] sm:$0xff]  ;;  %v46_v1 = vld [vmem:[#allocation3 + $0x8] sm:$0xff]  ;;  %s187_s1 = smov [#allocation8]  }
  0x27   :  { %v47_v2 = vmax.f32 %v45_v0, 1e-07  ;;  %v48_v3 = vmax.f32 %v46_v1, 1e-07  ;;  %v51_v8 = vld [vmem:[#allocation6] sm:$0xff]  ;;  %v52_v9 = vld [vmem:[#allocation6 + $0x8] sm:$0xff] }
  0x28   :  { %v53_v10 = vmax.f32 %v51_v8, 1e-07  ;;  %v54_v12 = vmax.f32 %v52_v9, 1e-07  ;;  %s88_s6 = sshll.u32 %s187_s1, 4  ;;  %s89_s6 = int_to_ptr.vmem [resolvable:$true] %s88_s6 }
  0x29   :  { %v49_v4 = vmin.f32 %v47_v2, 0.9999999  ;;  %v50_v5 = vmin.f32 %v48_v3, 0.9999999  ;;  %s155_s7 = scalar_lea.vmem %s89_s6, 128  ;;  %p160_p3 = scmp.lt.s32.totalorder %s89_s6, %s89_s6 }
  0x2a   :  { %v55_v18 = vmin.f32 %v53_v10, 0.9999999  ;;  %v56_v20 = vmin.f32 %v54_v12, 0.9999999  ;;  %p156_p2 = scmp.ne.s32.totalorder %s89_s6, %s155_s7  ;;  %p161_p4 = scmp.lt.s32.totalorder %s155_s7, %s155_s7 }
  0x2b   :  { %103 = vlog2.f32 %v49_v4  ;;  %v61_v6 = vsub.f32 1.0, %v49_v4  ;;  %v62_v7 = vsub.f32 1.0, %v50_v5 }
  0x2c   :  { %105 = vlog2.f32 %v50_v5  ;;  %p162_p5 = por %p161_p4, %p160_p3 }
  0x2d   :  { %107 = vlog2.f32 %v61_v6 }
  0x2e   :  { %109 = vlog2.f32 %v62_v7  ;;  %p163_p6 = pnand %p162_p5, %p156_p2 }
  0x35   :  { %v104_v11 = vpop.eup %103 }
  0x36   :  { %v106_v13 = vpop.eup %105  ;;  %v58_v14 = vmul.f32 0.6931472, %v104_v11 }
  0x37   :  { %v108_v15 = vpop.eup %107  ;;  %v60_v16 = vmul.f32 0.6931472, %v106_v13 }
  0x38   :  { %v110_v17 = vpop.eup %109  ;;  %v64_v19 = vmul.f32 0.6931472, %v108_v15 }
  0x39   :  { %v66_v21 = vmul.f32 0.6931472, %v110_v17 }
  0x3a   :  { %v67_v22 = vsub.f32 %v58_v14, %v64_v19 }
  0x3b   :  { %v68_v23 = vsub.f32 %v60_v16, %v66_v21 }
  0x3c   :  { %v69_v24 = vmul.f32 %v67_v22, %v55_v18 }
  0x3d   :  { %v70_v25 = vmul.f32 %v68_v23, %v56_v20 }
  0x3e   :  { %v71_v26 = vadd.f32 %v69_v24, %v64_v19 }
  0x3f   :  { %v72_v27 = vadd.f32 %v70_v25, %v66_v21 }
  0x41   :  { %v74_v28 = vadd.f32 %v72_v27, %v71_v26 }
  0x43   :  { %v75_v29 = vsub.f32 0.0, %v74_v28 }
  0x45   :  { %81 = vst [vmem:[#allocation8] sm:$0xff] %v75_v29 }
  0x46   :  { %166 = shalt.err (!%p163_p6)
}
  0x47   :  { %s167_s10 = scalar_lea.hbm %s241_s2, 128 }
  0x48   :  { %p168_p7 = scmp.ne.s32.totalorder %s241_s2, %s167_s10  ;;  %p171_p8 = scmp.lt.u32.totalorder %s167_s10, %s241_s2 }
  0x4a   :  { %p173_p9 = pnand %p171_p8, %p168_p7 }
  0x4c   :  { %176 = shalt.err (!%p173_p9)
}
  0x4d   :  { %91 = dma.vmem_to_hbm [thread:$0]  %s89_s6, 128, %s241_s2, [#allocation5]  }
  0x4e   :  { %181 = dma.done.wait [#allocation5], 128  }
  0x4f   :  { %182 = vsyncadd [#allocation5], 4294967168 }
  0x50   :  { %95 = vsyncpa [#allocation4], 1 }
  0x51   :  { %96 = vsyncpa [#allocation7], 1 }
  0x52   :  { %97 = vsyncpa [#allocation5], 1 }

</bundles_post_ra>
